<compile_context>
chip_gen: v5e
topology: v5e:2x2
jax: 0.10.0
libtpu: 0.0.40
codegen_flags: <defaults>
</compile_context>

<pallas_src>
import functools

import jax
import jax.numpy as jnp
from jax import lax
from jax.experimental import pallas as pl
from jax.experimental.pallas import tpu as pltpu


def _round_up(n, m):
    return ((n + m - 1) // m) * m


# --------------------------------------------------------------------------
# Pallas kernel
# --------------------------------------------------------------------------

def _avgpool11_kernel(x_ref, o_ref, acc_ref, *, inv_hw, hw, tile_hw, need_mask):
    """Row-wise spatial mean with HW-axis (reduction) tiling.

    x_ref:   (tile_r, tile_hw) block of the flattened (R, H*W) input.
    o_ref:   (tile_r, 1) per-row means (written on the last k step).
    acc_ref: (tile_r, 1) f32 accumulator scratch, resident across the k axis.
    """
    k = pl.program_id(1)

    @pl.when(k == 0)
    def _():
        acc_ref[...] = jnp.zeros_like(acc_ref)

    x = x_ref[...]
    if need_mask:
        # HW is not a multiple of tile_hw: zero the out-of-bounds tail lanes so
        # garbage in the partial last block never enters the sum.
        col = k * tile_hw + lax.broadcasted_iota(jnp.int32, x.shape, 1)
        x = jnp.where(col < hw, x, jnp.zeros_like(x))

    # Widening folded into the reduce: keeps bf16/int8 blocks packed (no full
    # f32 copy of the tile), accumulates in f32 on the XLU lane-reduce path.
    acc_ref[...] += jnp.sum(x, axis=-1, keepdims=True, dtype=jnp.float32)

    @pl.when(k == pl.num_programs(1) - 1)
    def _():
        o_ref[...] = (acc_ref[...] * inv_hw).astype(o_ref.dtype)


# --------------------------------------------------------------------------
# Wrapper
# --------------------------------------------------------------------------

def avg_pool_11(x,
                *,
                max_block_bytes=6 * 1024 * 1024,   # per input buffer (2x buffered)
                min_pallas_bytes=1 << 20,          # below this, let XLA fuse it
                force_pallas=False):
    """AvgPool11.forward: mean over the last two dims, keepdim on both.

    Works for any input with >= 2 dims; leading dims are flattened into rows.
    """
    *lead, H, W = x.shape
    R = 1
    for d in lead:
        R *= d
    HW = H * W
    itemsize = jnp.dtype(x.dtype).itemsize
    total_bytes = R * HW * itemsize

    # Degenerate shapes and small inputs: a standalone Pallas kernel is pure
    # launch/step overhead here; XLA's fused reduction wins and can fuse with
    # neighbors.  (Degenerate shapes also match torch semantics, e.g. NaN for
    # HW == 0.)
    if R == 0 or HW == 0 or (not force_pallas and total_bytes < min_pallas_bytes):
        return jnp.mean(x, axis=(-2, -1), keepdims=True)

    x2 = x.reshape(R, HW)                         # contiguous view, no copy

    # Sublane packing of this dtype: 8 rows for 4-byte, 16 for 2-byte, 32 for
    # 1-byte elements.  tile_r is always a multiple of this.
    pack_r = max(8, 32 // itemsize)
    row_bytes = HW * itemsize

    if pack_r * row_bytes <= max_block_bytes:
        # ---- full-HW path: single reduction step per row block -------------
        tile_hw = HW
        tile_r = max(pack_r, (max_block_bytes // row_bytes) // pack_r * pack_r)
    else:
        # ---- K-tiled path: minimum row pack, tile the reduction axis -------
        tile_r = pack_r
        tile_hw = (max_block_bytes // (tile_r * itemsize)) // 128 * 128
        tile_hw = max(128, min(tile_hw, _round_up(HW, 128)))
        if tile_hw >= HW:
            tile_hw = HW

    # Never ask for more rows than exist (rounded to the pack so the block
    # shape stays sublane-legal; partial tails use masked stores).
    tile_r = min(tile_r, _round_up(R, pack_r))
    # Keep >= 2 row blocks when R allows it: the "parallel" axis can then be
    # sharded across v7x's two TensorCores and the pipeline keeps streaming.
    if R > pack_r:
        tile_r = min(tile_r, _round_up(pl.cdiv(R, 2), pack_r))

    nr = pl.cdiv(R, tile_r)
    nk = pl.cdiv(HW, tile_hw)
    need_mask = (HW % tile_hw) != 0

    out_itemsize = itemsize  # output keeps the input dtype
    cost = pl.CostEstimate(
        flops=R * HW,
        transcendentals=0,
        bytes_accessed=R * HW * itemsize + R * out_itemsize,
    )

    kernel = functools.partial(
        _avgpool11_kernel,
        inv_hw=1.0 / HW,
        hw=HW,
        tile_hw=tile_hw,
        need_mask=need_mask,
    )

    out2 = pl.pallas_call(
        kernel,
        out_shape=jax.ShapeDtypeStruct((R, 1), x.dtype),
        grid=(nr, nk),
        in_specs=[pl.BlockSpec((tile_r, tile_hw), lambda i, k: (i, k))],
        out_specs=pl.BlockSpec((tile_r, 1), lambda i, k: (i, 0)),
        scratch_shapes=[pltpu.VMEM((tile_r, 1), jnp.float32)],
        compiler_params=pltpu.CompilerParams(
            dimension_semantics=("parallel", "arbitrary"),
            vmem_limit_bytes=32 * 1024 * 1024,
        ),
        cost_estimate=cost,
    )(x2)

    return out2.reshape(*lead, 1, 1)


# --------------------------------------------------------------------------
# Demo / self-test
# --------------------------------------------------------------------------

if __name__ == "__main__":
    key = jax.random.PRNGKey(0)
    k1, k2 = jax.random.split(key)

    # 1) Module-scale input, Pallas path forced (full-HW, single-k path).
    x = jax.random.uniform(k1, (2, 4, 16, 16), jnp.float32)
    fn = jax.jit(functools.partial(avg_pool_11, force_pallas=True))
    out = jax.block_until_ready(fn(x))
    assert out.shape == (2, 4, 1, 1) and out.dtype == jnp.float32
    ref = jnp.mean(x, axis=(-2, -1), keepdims=True)
    assert bool(jnp.allclose(out, ref, atol=1e-6, rtol=1e-6)), "f32 mismatch"

    # 2) bf16 input with a tiny VMEM budget to exercise the K-tiled
    #    (accumulator + masked HW tail) path.
    xb = jax.random.uniform(k2, (4, 2, 65, 80), jnp.bfloat16)
    fnb = jax.jit(functools.partial(avg_pool_11, force_pallas=True,
                                    max_block_bytes=16 * 1024))
    outb = jax.block_until_ready(fnb(xb))
    assert outb.shape == (4, 2, 1, 1) and outb.dtype == jnp.bfloat16
    refb = jnp.mean(xb.astype(jnp.float32), axis=(-2, -1), keepdims=True)
    assert bool(jnp.allclose(outb.astype(jnp.float32), refb,
                             atol=1e-2, rtol=1e-2)), "bf16 mismatch"

    # 3) Default call (small-input fallback path).
    out_fb = jax.block_until_ready(jax.jit(avg_pool_11)(x))
    assert bool(jnp.allclose(out_fb, ref, atol=1e-6, rtol=1e-6)), "fallback mismatch"

    print("KERNEL_OK")
</pallas_src>

<mosaic_0001>
module attributes {stable_mosaic.version = 11 : i64} {
  func.func @_avgpool11_kernel(%arg0: i32, %arg1: i32, %arg2: memref<8x256xf32, #tpu.memory_space<vmem>>, %arg3: memref<8x1xf32, #tpu.memory_space<vmem>>, %arg4: memref<8x1xf32, #tpu.memory_space<vmem>>) attributes {dimension_semantics = [#tpu.dimension_semantics<parallel>, #tpu.dimension_semantics<arbitrary>], iteration_bounds = array<i64: 1, 1>, scalar_prefetch = 0 : i64, scratch_operands = 1 : i64, tpu.core_type = #tpu.core_type<tc>, window_params = [{transform_indices = @transform_0, window_bounds = array<i64: 8, 256>}, {transform_indices = @transform_1, window_bounds = array<i64: 8, 1>}]} {
    %c0_i32 = arith.constant 0 : i32
    %0 = arith.cmpi eq, %arg1, %c0_i32 : i32
    %1 = arith.extui %0 : i1 to i32
    %c0_i32_0 = arith.constant 0 : i32
    %2 = arith.cmpi ne, %1, %c0_i32_0 : i32
    scf.if %2 {
      %cst_8 = arith.constant 0.000000e+00 : f32
      %12 = vector.broadcast %cst_8 : f32 to vector<8x1xf32>
      %c0_9 = arith.constant 0 : index
      %c0_10 = arith.constant 0 : index
      %13 = vector.load %arg4[%c0_9, %c0_10] : memref<8x1xf32, #tpu.memory_space<vmem>>, vector<8x1xf32>
      tpu.vector_store %arg4[%c0_9, %c0_10], %12 {strides = array<i32>} : memref<8x1xf32, #tpu.memory_space<vmem>>, vector<8x1xf32>,
    } else {
    }
    %c0 = arith.constant 0 : index
    %c0_1 = arith.constant 0 : index
    %3 = vector.load %arg2[%c0, %c0_1] : memref<8x256xf32, #tpu.memory_space<vmem>>, vector<8x256xf32>
    %c0_2 = arith.constant 0 : index
    %c0_3 = arith.constant 0 : index
    %4 = vector.load %arg4[%c0_2, %c0_3] : memref<8x1xf32, #tpu.memory_space<vmem>>, vector<8x1xf32>
    %cst = arith.constant dense<0.000000e+00> : vector<8xf32>
    %5 = vector.multi_reduction <add>, %3, %cst [1] : vector<8x256xf32> to vector<8xf32>
    %6 = vector.shape_cast %5 : vector<8xf32> to vector<8x1xf32>
    %7 = arith.addf %4, %6 : vector<8x1xf32>
    %c0_4 = arith.constant 0 : index
    %c0_5 = arith.constant 0 : index
    %8 = vector.load %arg4[%c0_4, %c0_5] : memref<8x1xf32, #tpu.memory_space<vmem>>, vector<8x1xf32>
    tpu.vector_store %arg4[%c0_4, %c0_5], %7 {strides = array<i32>} : memref<8x1xf32, #tpu.memory_space<vmem>>, vector<8x1xf32>,
    %c0_i32_6 = arith.constant 0 : i32
    %9 = arith.cmpi eq, %arg1, %c0_i32_6 : i32
    %10 = arith.extui %9 : i1 to i32
    %c0_i32_7 = arith.constant 0 : i32
    %11 = arith.cmpi ne, %10, %c0_i32_7 : i32
    scf.if %11 {
      %c0_8 = arith.constant 0 : index
      %c0_9 = arith.constant 0 : index
      %12 = vector.load %arg4[%c0_8, %c0_9] : memref<8x1xf32, #tpu.memory_space<vmem>>, vector<8x1xf32>
      %cst_10 = arith.constant 3.906250e-03 : f32
      %13 = vector.broadcast %cst_10 : f32 to vector<8x1xf32>
      %14 = arith.mulf %12, %13 : vector<8x1xf32>
      %c0_11 = arith.constant 0 : index
      %c0_12 = arith.constant 0 : index
      %15 = vector.load %arg3[%c0_11, %c0_12] : memref<8x1xf32, #tpu.memory_space<vmem>>, vector<8x1xf32>
      tpu.vector_store %arg3[%c0_11, %c0_12], %14 {strides = array<i32>} : memref<8x1xf32, #tpu.memory_space<vmem>>, vector<8x1xf32>,
    } else {
    }
    return
  }
  func.func @transform_0(%arg0: i32, %arg1: i32) -> (i32, i32) {
    %c0_i32 = arith.constant 0 : i32
    return %arg0, %arg1 : i32, i32
  }
  func.func @transform_1(%arg0: i32, %arg1: i32) -> (i32, i32) {
    %c0_i32 = arith.constant 0 : i32
    %c0_i32_0 = arith.constant 0 : i32
    return %arg0, %c0_i32 : i32, i32
  }
}

</mosaic_0001>

<bundles_post_ra>
// kernel: avg_pool_11.1
= control target key start
LH: loop header
LB: loop body
LE: loop exit
PB: predicated region body
PF: predicated region fallthrough
CT: control target
= control target key end

     0   :  { %vm12_vm0 = vcmask 7168   ;;  %v34_v2 = vmov 0.0   ;;  %s54_s0 = inlined_call_operand.vmem [shape: f32[8,256], index: 0, kind: input, shape index: {}]   ;;  %s55_s1 = inlined_call_operand.vmem [shape: f32[8,1], index: 1, kind: output, shape index: {}]  }
   0x1   :  { %v14_v0 = vld [vmem:[%s54_s0] sm:$0xff]  ;;  %v15_v1 = vld [vmem:[%s54_s0 + $0x8] sm:$0xff]  ;;  %13 = vst.msk [vmem:[#allocation2] sm:$0xff] %vm12_vm0, %v34_v2 }
   0x2   :  { %v17_v3 = vadd.f32 %v15_v1, %v14_v0 }
   0x4   :  { %18 = vadd.xlane.f32.xlu0 %v17_v3 }
   0x8   :  { %v16_v4 = vld [vmem:[#allocation2] sm:$0xff] }
  0x77   :  { %v19_v5 = vpop.xlane.xlu0 %18 }
  0x78   :  { %v20_v6 = vadd.f32 %v19_v5, %v16_v4 }
  0x7a   :  { %22 = vst.msk [vmem:[#allocation2] sm:$0xff] %vm12_vm0, %v20_v6 }
  0x81   :  { %v26_v7 = vld [vmem:[#allocation2] sm:$0xff] }
  0x82   :  { %v27_v8 = vmul.f32 0.00390625, %v26_v7 }
  0x84   :  { %28 = vst.msk [vmem:[%s55_s1] sm:$0xff] %vm12_vm0, %v27_v8 }

</bundles_post_ra>
